<compile_context>
chip_gen: v6e
topology: v6e:2x2x1
jax: 0.10.0
libtpu: 0.0.40
codegen_flags: <defaults>
</compile_context>

<pallas_src>
import jax
import jax.numpy as jnp
from jax import lax
from jax.experimental import pallas as pl
from jax.experimental.pallas import tpu as pltpu


# ----------------------------- VMEM budgeting --------------------------------
def _vmem_budget_bytes():
    """~75% of physical VMEM (generation-aware: v7x=64MiB, v5e/v6e=128MiB)."""
    cap = 64 << 20  # conservative fallback (v7x-sized)
    try:
        info = pltpu.get_tpu_info()
        cap = int(getattr(info, "vmem_capacity_bytes", cap))
    except Exception:
        pass
    return max((cap * 3) // 4, 16 << 20)


# --------------------------- kernel A: prototypes ----------------------------
def _proto_kernel(bm_ref, im_ref, tm_ref, sup_ref, proto_ref):
    bm = bm_ref[0]                      # (1, NKL) f32
    im = im_ref[0]
    tm = tm_ref[0]
    om = (1.0 - bm - im) * tm           # "O" tokens: in-text, neither B nor I

    C = proto_ref.shape[1]              # N + 1
    NKL = im.shape[-1]                  # N * K * L
    KL = NKL // (C - 1)                 # support tokens per class (K * L)

    # (C, NKL) class-weight matrix: row 0 = O-mask over all support tokens,
    # row 1+n = I-mask restricted to class n's token block.
    r = lax.broadcasted_iota(jnp.int32, (C, NKL), 0)
    p = lax.broadcasted_iota(jnp.int32, (C, NKL), 1)
    lo = (r - 1) * KL
    in_class = jnp.logical_and(p >= lo, p < lo + KL)
    w = jnp.where(r == 0, om, jnp.where(in_class, im, 0.0))        # (C, NKL)

    cnt = jnp.sum(w, axis=1, keepdims=True) + 1e-8                 # (C, 1)
    sup = sup_ref[0]                                               # (NKL, D)
    psum = lax.dot_general(                                        # one MXU matmul
        w.astype(sup.dtype), sup,
        dimension_numbers=(((1,), (0,)), ((), ())),
        preferred_element_type=jnp.float32)                        # (C, D) f32
    proto_ref[0] = (psum / cnt).astype(proto_ref.dtype)


def _proto_pallas(bm, im, tm, sup, num_classes):
    B, _, NKL = bm.shape
    D = sup.shape[-1]
    C = num_classes
    isz = jnp.dtype(sup.dtype).itemsize
    block = 3 * NKL * 4 + NKL * D * isz + C * D * isz
    vmem_limit = int(min(max(2 * block + C * NKL * 4 + (4 << 20), 16 << 20),
                         _vmem_budget_bytes()))

    mask_spec = pl.BlockSpec((1, 1, NKL), lambda b: (b, 0, 0))
    return pl.pallas_call(
        _proto_kernel,
        out_shape=jax.ShapeDtypeStruct((B, C, D), sup.dtype),
        grid_spec=pltpu.PrefetchScalarGridSpec(
            num_scalar_prefetch=0,
            grid=(B,),
            in_specs=[mask_spec, mask_spec, mask_spec,
                      pl.BlockSpec((1, NKL, D), lambda b: (b, 0, 0))],
            out_specs=pl.BlockSpec((1, C, D), lambda b: (b, 0, 0)),
        ),
        compiler_params=pltpu.CompilerParams(
            dimension_semantics=("parallel",),
            vmem_limit_bytes=vmem_limit,
        ),
    )(bm, im, tm, sup)


# ------------------- kernel B: similarity + fused epilogue -------------------
def _sim_kernel(p_ref, q_ref, logits_ref, col0_ref, maxr_ref, argr_ref):
    proto = p_ref[0]                                               # (C, D)
    q = q_ref[0]                                                   # (tT, D)
    C = proto.shape[0]

    # Class-major similarities: lane axis = tT -> lane-dense reductions/stores.
    s_cm = lax.dot_general(
        proto, q, dimension_numbers=(((1,), (1,)), ((), ())),
        preferred_element_type=jnp.float32)                        # (C, tT) f32

    col0_ref[0] = s_cm[0:1, :]                                     # (1, tT)

    rest = s_cm[1:, :]                                             # (C-1, tT)
    mx = jnp.max(rest, axis=0, keepdims=True)                      # (1, tT)
    idx = lax.broadcasted_iota(jnp.int32, rest.shape, 0)
    first_arg = jnp.min(jnp.where(rest >= mx, idx, C - 1),
                        axis=0, keepdims=True)                     # (1, tT) i32
    maxr_ref[0] = mx
    argr_ref[0] = first_arg

    # Query-major copy for the caller-facing (B, T, C) logits. The MXU is idle
    # (kernel is HBM-bound), so a second tiny matmul is cheaper/safer than an
    # XLU relayout, and it removes the post-kernel XLA transpose entirely.
    s_qm = lax.dot_general(
        q, proto, dimension_numbers=(((1,), (1,)), ((), ())),
        preferred_element_type=jnp.float32)                        # (tT, C)
    logits_ref[0] = s_qm.astype(logits_ref.dtype)


def _choose_t_tile(T, D, C, itemsize, budget):
    """Largest query tile fitting the VMEM budget (full T if possible,
    otherwise a 128-multiple so every store stays lane-dense/unmasked)."""
    def need(tT):
        # double-buffered query tile + proto + 4 output tiles + headroom
        return (2 * tT * (D * itemsize + (C + 3) * 4)
                + 4 * C * D * itemsize + (2 << 20))
    if need(T) <= budget:
        return T
    for cand in (8192, 4096, 2048, 1024, 512, 256, 128):
        if need(cand) <= budget:
            return cand
    return 128


def _sim_pallas(proto, qry):
    B, C, D = proto.shape
    _, T, _ = qry.shape
    isz = jnp.dtype(qry.dtype).itemsize
    budget = _vmem_budget_bytes()

    tT = _choose_t_tile(T, D, C, isz, budget)
    if tT == T:
        T_pad, nT = T, 1
    else:
        nT = pl.cdiv(T, tT)
        T_pad = nT * tT
        if T_pad != T:
            # Pad so every tile is full -> lane-dense stores; sliced off later.
            qry = jnp.pad(qry, ((0, 0), (0, T_pad - T), (0, 0)))

    vmem_limit = int(min(max(2 * tT * (D * isz + (C + 3) * 4)
                             + 4 * C * D * isz + (4 << 20), 16 << 20), budget))

    lane_spec = pl.BlockSpec((1, 1, tT), lambda b, t: (b, 0, t))
    return pl.pallas_call(
        _sim_kernel,
        out_shape=(jax.ShapeDtypeStruct((B, T_pad, C), jnp.float32),
                   jax.ShapeDtypeStruct((B, 1, T_pad), jnp.float32),
                   jax.ShapeDtypeStruct((B, 1, T_pad), jnp.float32),
                   jax.ShapeDtypeStruct((B, 1, T_pad), jnp.int32)),
        grid_spec=pltpu.PrefetchScalarGridSpec(
            num_scalar_prefetch=0,
            grid=(B, nT),
            in_specs=[pl.BlockSpec((1, C, D), lambda b, t: (b, 0, 0)),
                      pl.BlockSpec((1, tT, D), lambda b, t: (b, t, 0))],
            out_specs=[pl.BlockSpec((1, tT, C), lambda b, t: (b, t, 0)),
                       lane_spec, lane_spec, lane_spec],
        ),
        compiler_params=pltpu.CompilerParams(
            # both axes fully independent -> megacore shards either one (v7x)
            dimension_semantics=("parallel", "parallel"),
            vmem_limit_bytes=vmem_limit,
        ),
    )(proto, qry)


# ------------------------------ forward glue ---------------------------------
def proto_dot_forward(support_emb, query_emb, b_mask, i_mask, text_mask,
                      N, K, Q, max_len, feature_size, threshold="mean"):
    """ProtoDot.forward with use_BIO=False, O=0, distance_metric='dot',
    trigger_label=None (inference path; loss branch skipped).

    Compute dtype == embedding dtype: for bf16 HBM traffic, have the encoder
    emit bf16 embeddings (a wrapper-side astype would add a full extra HBM
    pass over the dominant query stream).
    """
    D = feature_size
    L = max_len
    B = support_emb.shape[0] // (N * K)
    NQ = N * Q
    T = NQ * L
    NKL = N * K * L
    C = N + 1

    sup = support_emb.reshape(B, NKL, D)
    qry = query_emb.reshape(B, T, D)
    bm = b_mask.reshape(B, 1, NKL).astype(jnp.float32)
    im = i_mask.reshape(B, 1, NKL).astype(jnp.float32)
    tm = text_mask.reshape(B, 1, NKL).astype(jnp.float32)

    prototype = _proto_pallas(bm, im, tm, sup, C)                  # (B, C, D)
    logits_qm, col0, max_rest, arg_rest = _sim_pallas(prototype, qry)

    col0 = col0[:, 0, :T]                                          # (B, T)
    max_rest = max_rest[:, 0, :T]
    arg_rest = arg_rest[:, 0, :T]

    if threshold == "mean":
        stat = jnp.mean(col0)
    elif threshold == "max":
        stat = jnp.max(col0)
    else:
        stat = None

    if stat is None:
        pred = jnp.where(col0 >= max_rest, 0, 1 + arg_rest).reshape(-1)
        logits = logits_qm[:, :T, :]
    else:
        pred = jnp.where(stat >= max_rest, 0, 1 + arg_rest).reshape(-1)
        col0_fill = jnp.full((B, T, 1), stat, dtype=logits_qm.dtype)
        logits = jnp.concatenate([col0_fill, logits_qm[:, :T, 1:]], axis=-1)
    logits = logits.reshape(B, NQ, L, C)

    sup_out = support_emb.reshape(B, N, K, L, D)
    qry_out = query_emb.reshape(B, NQ, L, D)
    # TODO(synk): loss / SupConLoss / ProtoConLoss / projection_head /
    # similarity_mlp / Wk-Wq-Wv proto_interaction branches are not exercised
    # (trigger_label=None, contrastive='None') and their defs are not part of
    # the provided module source.
    return logits, pred, sup_out, qry_out, prototype


if __name__ == "__main__":
    B, N, K, Q, L, D = 2, 2, 2, 2, 8, 32        # small synthetic episode
    C = N + 1
    key = jax.random.PRNGKey(0)
    k1, k2, k3 = jax.random.split(key, 3)

    # deterministic "encoder outputs" (dropout = identity in eval mode)
    support_emb = jax.random.normal(k1, (B * N * K, L, D), dtype=jnp.float32)
    query_emb = jax.random.normal(k2, (B * N * Q, L, D), dtype=jnp.float32)

    # token tags: 0 = O, 1 = B, 2 = I (inside the text mask)
    tags = jax.random.randint(k3, (B, N, K, L), 0, 3)
    text_mask = (jnp.arange(L)[None, None, None, :] < 6).astype(jnp.float32) \
        * jnp.ones((B, N, K, 1), jnp.float32)
    b_mask = (tags == 1).astype(jnp.float32) * text_mask
    i_mask = (tags == 2).astype(jnp.float32) * text_mask

    # ---- f32 path ----
    logits, pred, sup_out, qry_out, prototype = proto_dot_forward(
        support_emb, query_emb, b_mask, i_mask, text_mask,
        N=N, K=K, Q=Q, max_len=L, feature_size=D)
    jax.block_until_ready((logits, pred, prototype))

    # ---- pure-JAX reference (mirrors the torch semantics) ----
    hi = jax.lax.Precision.HIGHEST
    sup_r = support_emb.reshape(B, N, K, L, D)
    qry_r = query_emb.reshape(B, N * Q, L, D)
    om = (1.0 - b_mask - i_mask) * text_mask
    sum_i = jnp.einsum("bnkl,bnkld->bnd", i_mask, sup_r, precision=hi)
    cnt_i = i_mask.sum(axis=(2, 3)) + 1e-8
    cls_ref = sum_i / cnt_i[..., None]
    sum_o = jnp.einsum("bnkl,bnkld->bd", om, sup_r, precision=hi)
    cnt_o = om.sum(axis=(1, 2, 3)) + 1e-8
    o_ref = sum_o / cnt_o[:, None]
    proto_ref = jnp.concatenate([o_ref[:, None, :], cls_ref], axis=1)
    sim_ref = jnp.einsum("bqld,bcd->bqlc", qry_r, proto_ref, precision=hi)
    logits_ref = sim_ref.at[..., 0].set(jnp.mean(sim_ref[..., 0]))
    pred_ref = jnp.argmax(logits.reshape(-1, C), axis=1)

    assert jnp.allclose(prototype, proto_ref, atol=1e-3, rtol=1e-3), \
        float(jnp.max(jnp.abs(prototype - proto_ref)))
    assert jnp.allclose(logits, logits_ref, atol=1e-3, rtol=1e-3), \
        float(jnp.max(jnp.abs(logits - logits_ref)))
    assert jnp.array_equal(pred, pred_ref)

    # ---- bf16 path: encoder emits bf16 (no wrapper-side cast pass) ----
    logits_bf16, pred_bf16, _, _, _ = proto_dot_forward(
        support_emb.astype(jnp.bfloat16), query_emb.astype(jnp.bfloat16),
        b_mask, i_mask, text_mask, N=N, K=K, Q=Q, max_len=L, feature_size=D)
    jax.block_until_ready((logits_bf16, pred_bf16))
    assert jnp.allclose(logits_bf16, logits_ref, atol=2.5e-1, rtol=5e-2), \
        float(jnp.max(jnp.abs(logits_bf16 - logits_ref)))

    print("KERNEL_OK")
</pallas_src>

<mosaic_0001>
module attributes {stable_mosaic.version = 11 : i64} {
  func.func @_proto_kernel(%arg0: i32, %arg1: memref<1x1x32xf32, #tpu.memory_space<vmem>>, %arg2: memref<1x1x32xf32, #tpu.memory_space<vmem>>, %arg3: memref<1x1x32xf32, #tpu.memory_space<vmem>>, %arg4: memref<1x32x32xf32, #tpu.memory_space<vmem>>, %arg5: memref<1x3x32xf32, #tpu.memory_space<vmem>>) attributes {dimension_semantics = [#tpu.dimension_semantics<parallel>], iteration_bounds = array<i64: 2>, scalar_prefetch = 0 : i64, scratch_operands = 0 : i64, tpu.core_type = #tpu.core_type<tc>, window_params = [{transform_indices = @transform_0, window_bounds = array<i64: 1, 1, 32>}, {transform_indices = @transform_1, window_bounds = array<i64: 1, 1, 32>}, {transform_indices = @transform_2, window_bounds = array<i64: 1, 1, 32>}, {transform_indices = @transform_3, window_bounds = array<i64: 1, 32, 32>}, {transform_indices = @transform_4, window_bounds = array<i64: 1, 3, 32>}]} {
    %c0 = arith.constant 0 : index
    %c0_0 = arith.constant 0 : index
    %c0_1 = arith.constant 0 : index
    %0 = vector.load %arg1[%c0, %c0_0, %c0_1] : memref<1x1x32xf32, #tpu.memory_space<vmem>>, vector<1x1x32xf32>
    %1 = vector.shape_cast %0 : vector<1x1x32xf32> to vector<1x32xf32>
    %c0_2 = arith.constant 0 : index
    %c0_3 = arith.constant 0 : index
    %c0_4 = arith.constant 0 : index
    %2 = vector.load %arg2[%c0_2, %c0_3, %c0_4] : memref<1x1x32xf32, #tpu.memory_space<vmem>>, vector<1x1x32xf32>
    %3 = vector.shape_cast %2 : vector<1x1x32xf32> to vector<1x32xf32>
    %c0_5 = arith.constant 0 : index
    %c0_6 = arith.constant 0 : index
    %c0_7 = arith.constant 0 : index
    %4 = vector.load %arg3[%c0_5, %c0_6, %c0_7] : memref<1x1x32xf32, #tpu.memory_space<vmem>>, vector<1x1x32xf32>
    %5 = vector.shape_cast %4 : vector<1x1x32xf32> to vector<1x32xf32>
    %cst = arith.constant 1.000000e+00 : f32
    %6 = vector.broadcast %cst : f32 to vector<1x32xf32>
    %7 = arith.subf %6, %1 : vector<1x32xf32>
    %8 = arith.subf %7, %3 : vector<1x32xf32>
    %9 = arith.mulf %8, %5 : vector<1x32xf32>
    %10 = tpu.iota {dimensions = array<i32: 0>} : vector<3x32xi32>
    %11 = tpu.iota {dimensions = array<i32: 1>} : vector<3x32xi32>
    %c1_i32 = arith.constant 1 : i32
    %12 = vector.broadcast %c1_i32 : i32 to vector<3x32xi32>
    %13 = arith.subi %10, %12 : vector<3x32xi32>
    %c16_i32 = arith.constant 16 : i32
    %14 = vector.broadcast %c16_i32 : i32 to vector<3x32xi32>
    %15 = arith.muli %13, %14 : vector<3x32xi32>
    %16 = arith.cmpi sge, %11, %15 : vector<3x32xi32>
    %c16_i32_8 = arith.constant 16 : i32
    %17 = vector.broadcast %c16_i32_8 : i32 to vector<3x32xi32>
    %18 = arith.addi %15, %17 : vector<3x32xi32>
    %19 = arith.cmpi slt, %11, %18 : vector<3x32xi32>
    %20 = arith.andi %16, %19 : vector<3x32xi1>
    %c0_i32 = arith.constant 0 : i32
    %21 = vector.broadcast %c0_i32 : i32 to vector<3x32xi32>
    %22 = arith.cmpi eq, %10, %21 : vector<3x32xi32>
    %cst_9 = arith.constant 0.000000e+00 : f32
    %23 = vector.shape_cast %3 : vector<1x32xf32> to vector<1x32xf32>
    %24 = vector.broadcast %23 : vector<1x32xf32> to vector<3x32xf32>
    %25 = vector.broadcast %cst_9 : f32 to vector<3x32xf32>
    %26 = arith.select %20, %24, %25 : vector<3x32xi1>, vector<3x32xf32>
    %27 = vector.shape_cast %9 : vector<1x32xf32> to vector<1x32xf32>
    %28 = vector.broadcast %27 : vector<1x32xf32> to vector<3x32xf32>
    %29 = arith.select %22, %28, %26 : vector<3x32xi1>, vector<3x32xf32>
    %cst_10 = arith.constant dense<0.000000e+00> : vector<3xf32>
    %30 = vector.multi_reduction <add>, %29, %cst_10 [1] : vector<3x32xf32> to vector<3xf32>
    %31 = vector.shape_cast %30 : vector<3xf32> to vector<3x1xf32>
    %cst_11 = arith.constant 9.99999993E-9 : f32
    %32 = vector.broadcast %cst_11 : f32 to vector<3x1xf32>
    %33 = arith.addf %31, %32 : vector<3x1xf32>
    %c0_12 = arith.constant 0 : index
    %c0_13 = arith.constant 0 : index
    %c0_14 = arith.constant 0 : index
    %34 = vector.load %arg4[%c0_12, %c0_13, %c0_14] : memref<1x32x32xf32, #tpu.memory_space<vmem>>, vector<1x32x32xf32>
    %35 = vector.shape_cast %34 : vector<1x32x32xf32> to vector<32x32xf32>
    %cst_15 = arith.constant dense<0.000000e+00> : vector<3x32xf32>
    %36 = tpu.matmul %29, %35, %cst_15 {dimension_numbers = #tpu.dot_dimension_numbers<[1], [0], [0], [1], [0, 0, 1, 1], [], []>} : vector<3x32xf32>, vector<32x32xf32>, vector<3x32xf32> -> vector<3x32xf32>
    %37 = vector.broadcast %33 : vector<3x1xf32> to vector<3x32xf32>
    %38 = arith.divf %36, %37 : vector<3x32xf32>
    %c0_16 = arith.constant 0 : index
    %c0_17 = arith.constant 0 : index
    %c0_18 = arith.constant 0 : index
    %39 = vector.load %arg5[%c0_16, %c0_17, %c0_18] : memref<1x3x32xf32, #tpu.memory_space<vmem>>, vector<1x3x32xf32>
    %40 = vector.shape_cast %39 : vector<1x3x32xf32> to vector<3x32xf32>
    %41 = vector.shape_cast %38 : vector<3x32xf32> to vector<1x3x32xf32>
    tpu.vector_store %arg5[%c0_16, %c0_17, %c0_18], %41 {strides = array<i32>} : memref<1x3x32xf32, #tpu.memory_space<vmem>>, vector<1x3x32xf32>,
    return
  }
  func.func @transform_0(%arg0: i32) -> (i32, i32, i32) {
    %c0_i32 = arith.constant 0 : i32
    %c0_i32_0 = arith.constant 0 : i32
    %c0_i32_1 = arith.constant 0 : i32
    return %arg0, %c0_i32, %c0_i32_0 : i32, i32, i32
  }
  func.func @transform_1(%arg0: i32) -> (i32, i32, i32) {
    %c0_i32 = arith.constant 0 : i32
    %c0_i32_0 = arith.constant 0 : i32
    %c0_i32_1 = arith.constant 0 : i32
    return %arg0, %c0_i32, %c0_i32_0 : i32, i32, i32
  }
  func.func @transform_2(%arg0: i32) -> (i32, i32, i32) {
    %c0_i32 = arith.constant 0 : i32
    %c0_i32_0 = arith.constant 0 : i32
    %c0_i32_1 = arith.constant 0 : i32
    return %arg0, %c0_i32, %c0_i32_0 : i32, i32, i32
  }
  func.func @transform_3(%arg0: i32) -> (i32, i32, i32) {
    %c0_i32 = arith.constant 0 : i32
    %c0_i32_0 = arith.constant 0 : i32
    %c0_i32_1 = arith.constant 0 : i32
    return %arg0, %c0_i32, %c0_i32_0 : i32, i32, i32
  }
  func.func @transform_4(%arg0: i32) -> (i32, i32, i32) {
    %c0_i32 = arith.constant 0 : i32
    %c0_i32_0 = arith.constant 0 : i32
    %c0_i32_1 = arith.constant 0 : i32
    return %arg0, %c0_i32, %c0_i32_0 : i32, i32, i32
  }
}

</mosaic_0001>

<bundles_post_ra>
// kernel: tpu_custom_call.1
= control target key start
LH: loop header
LB: loop body
LE: loop exit
PB: predicated region body
PF: predicated region fallthrough
CT: control target
= control target key end

     0   :  { %9 = vsyncpa [#allocation3], 0  ;;  %s954_s0 = inlined_call_operand.hbm [shape: f32[2,1,32], index: 0, kind: input, shape index: {}]   ;;  %s955_s1 = inlined_call_operand.hbm [shape: f32[2,1,32], index: 1, kind: input, shape index: {}]   ;;  %s956_s2 = inlined_call_operand.vmem [shape: f32[2,1,32], index: 2, kind: input, shape index: {}]   ;;  %s957_s3 = inlined_call_operand.hbm [shape: f32[2,32,32], index: 3, kind: input, shape index: {}]   ;;  %s958_s4 = inlined_call_operand.vmem [shape: f32[2,3,32], index: 4, kind: output, shape index: {}]  }
   0x1   :  { %11 = vsyncpa [#allocation3 + $0x1], 0 }
   0x2   :  { %12 = vsyncpa [#allocation5], 0 }
   0x3   :  { %14 = vsyncpa [#allocation5 + $0x1], 0  ;;  %s766_s15 = smov 0   ;;  %s768_s16 = smov 0  }
   0x4   :  { %s770_s17 = smov 0   ;;  %s772_s18 = smov 0  }
   0x5 LB: > { %s785_s19 = sadd.s32 4294967295, %s732_s18   ;;  %s788_s20 = sadd.s32 1, %s732_s18   ;;  %s732_s18 = sphi %s772_s18, %s969_s18   ;;  %s728_s17 = sphi %s770_s17, %s968_s17   ;;  %s724_s16 = sphi %s768_s16, %s967_s16   ;;  %s720_s15 = sphi %s766_s15, %s966_s15  }
   0x6   : > { %s24_s21 = ssub.s32 %s732_s18, %s788_s20  ;;  %s27_s22 = sadd.s32 1, %s728_s17 }
   0x7   : > { %p25_p0 = scmp.eq.s32.totalorder %s24_s21, 0  ;;  %p34_p1 = scmp.ne.s32.totalorder %s728_s17, %s724_s16 }
   0x8   : > { %p35_p2 = scmp.eq.s32.totalorder %s732_s18, 0  ;;  %p40_p3 = scmp.ne.s32.totalorder %s724_s16, %s720_s15 }
   0x9   : > { %s798_s23 = scalar_select %p25_p0, %s728_s17, %s27_s22  }
   0xa   : > { %p36_p4 = por %p35_p2, %p34_p1  ;;  %p41_p5 = scmp.eq.s32.totalorder %s785_s19, 0 }
   0xb   : > { %p571_p6 = scmp.lt.s32.totalorder %s732_s18, 2  ;;  %s807_s25 = sand.u32 1, %s728_s17  }
   0xc   : > { %p802_p7 = por %p41_p5, %p40_p3  ;;  %s526_s26 = sshll.u32 %s732_s18, 4 }
   0xd   : > { %p810_p8 = pnand %p571_p6, %p36_p4  ;;  %s185_s28 = sand.u32 1, %s732_s18  }
   0xe   : > { %s960_s24 = scalar_select %p802_p7, 1, 0 }
   0xf   : > { %s820_s5 = scalar_lea.hbm %s955_s1, %s526_s26  ;;  %s188_s6 = scalar_lea.vmem [#allocation4], %s807_s25 }
  0x10   : > { %s195_s7 = sshll.u32 %s188_s6, 4  ;;  %s528_s8 = sshll.u32 %s807_s25, 5  ;;  %s196_s7 = int_to_ptr.vmem [resolvable:$true] %s195_s7 }
  0x11   : > { %s824_s9 = scalar_lea.sflag [#allocation5], %s185_s28  ;;  %s610_s10 = scalar_lea.hbm %s820_s5, 16 }
  0x12   : > { %p611_p9 = scmp.ne.s32.totalorder %s820_s5, %s610_s10  ;;  %p830_p10 = pneg %p810_p8 }
  0x13   : > { %s615_s14 = scalar_lea.hbm %s955_s1, 32  ;;  %p616_p13 = scmp.lt.s32.totalorder %s820_s5, %s955_s1 }
  0x14   : > { %p613_p11 = pnand %p830_p10, %p611_p9  ;;  %p617_p0 = scmp.lt.s32.totalorder %s615_s14, %s610_s10 }
  0x16   : > { %p614_p12 = pneg %p613_p11  ;;  %p618_p1 = por %p617_p0, %p616_p13 }
  0x18   : > { %p619_p2 = pnand %p618_p1, %p614_p12 }
  0x1a   : > { %622 = shalt.err (!%p619_p2)
}
  0x1b   : > { %s623_s22 = scalar_lea.vmem %s196_s7, 16  ;;  %s734_s28 = smov [#allocation4]  }
  0x1c   : > { %p624_p3 = scmp.ne.s32.totalorder %s196_s7, %s623_s22  ;;  %s628_s29 = sshll.u32 %s734_s28, 4  ;;  %s629_s29 = int_to_ptr.vmem [resolvable:$false] %s628_s29 }
  0x1d   : > { %s630_s30 = scalar_lea.vmem %s629_s29, 32  ;;  %p631_p6 = scmp.lt.s32.totalorder %s196_s7, %s629_s29 }
  0x1e   : > { %p626_p4 = pnand %p624_p3, %p830_p10  ;;  %p632_p9 = scmp.lt.s32.totalorder %s630_s30, %s623_s22 }
  0x20   : > { %p627_p5 = pneg %p626_p4  ;;  %p633_p11 = por %p632_p9, %p631_p6 }
  0x22   : > { %p634_p7 = pnand %p633_p11, %p627_p5 }
  0x24   : > { %637 = shalt.err (!%p634_p7)
}
  0x25   : > { %567 = dma.hbm_to_vmem [thread:$0]  (!%p810_p8), %s820_s5, 16, %s196_s7, %s824_s9  }
  0x26   : > { %p531_p12 = scmp.ge.s32.totalorder %s732_s18, 1  ;;  %p227_p13 = scmp.lt.s32.totalorder %s732_s18, 3 }
  0x27   : > { %s860_s13 = scalar_lea.hbm %s954_s0, %s526_s26  ;;  %s171_s14 = scalar_lea.vmem [#allocation2], %s807_s25 }
  0x28   : > { %p851_p0 = pnand %p531_p12, %p227_p13  ;;  %s178_s15 = sshll.u32 %s171_s14, 4  ;;  %s179_s15 = int_to_ptr.vmem [resolvable:$true] %s178_s15 }
  0x29   : > { %s538_s21 = sshll.u32 %s732_s18, 9  ;;  %s169_s5 = scalar_lea.sflag [#allocation3], %s807_s25 }
  0x2a   : > { %s963_s6 = scalar_select %p851_p0, 1, 0 }
  0x2b   : > { %s638_s7 = scalar_lea.hbm %s860_s13, 16  ;;  %s643_s29 = scalar_lea.hbm %s954_s0, 32 }
  0x2c   : > { %p639_p7 = scmp.ne.s32.totalorder %s860_s13, %s638_s7  ;;  %p644_p3 = scmp.lt.s32.totalorder %s860_s13, %s954_s0 }
  0x2d   : > { %p645_p4 = scmp.lt.s32.totalorder %s643_s29, %s638_s7 }
  0x2e   : > { %p641_p1 = pnand %p639_p7, %p830_p10 }
  0x2f   : > { %p646_p5 = por %p645_p4, %p644_p3 }
  0x30   : > { %p642_p2 = pneg %p641_p1 }
  0x32   : > { %p647_p6 = pnand %p646_p5, %p642_p2 }
  0x34   : > { %650 = shalt.err (!%p647_p6)
}
  0x35   : > { %s651_s10 = scalar_lea.vmem %s179_s15, 16  ;;  %s735_s18 = smov [#allocation2]  }
  0x36   : > { %p652_p9 = scmp.ne.s32.totalorder %s179_s15, %s651_s10  ;;  %s656_s12 = sshll.u32 %s735_s18, 4  ;;  %s657_s12 = int_to_ptr.vmem [resolvable:$false] %s656_s12 }
  0x37   : > { %s658_s14 = scalar_lea.vmem %s657_s12, 32  ;;  %p659_p13 = scmp.lt.s32.totalorder %s179_s15, %s657_s12 }
  0x38   : > { %p654_p11 = pnand %p652_p9, %p830_p10  ;;  %p660_p7 = scmp.lt.s32.totalorder %s658_s14, %s651_s10 }
  0x3a   : > { %p655_p12 = pneg %p654_p11  ;;  %p661_p1 = por %p660_p7, %p659_p13 }
  0x3c   : > { %p662_p0 = pnand %p661_p1, %p655_p12 }
  0x3e   : > { %665 = shalt.err (!%p662_p0)
}
  0x3f   : > { %564 = dma.hbm_to_vmem [thread:$0]  (!%p810_p8), %s860_s13, 16, %s179_s15, %s169_s5  }
  0x40   : > { %s884_s28 = scalar_lea.hbm %s957_s3, %s538_s21  ;;  %s212_s29 = scalar_lea.vmem [#allocation6], %s528_s8 }
  0x41   : > { %s219_s30 = sshll.u32 %s212_s29, 4  ;;  %s666_s26 = scalar_lea.hbm %s884_s28, 512  ;;  %s888_s30 = int_to_ptr.vmem [resolvable:$true] %s219_s30 }
  0x42   : > { %p667_p0 = scmp.ne.s32.totalorder %s884_s28, %s666_s26  ;;  %s671_s15 = scalar_lea.hbm %s957_s3, 1024 }
  0x43   : > { %p672_p4 = scmp.lt.s32.totalorder %s884_s28, %s957_s3  ;;  %p673_p5 = scmp.lt.s32.totalorder %s671_s15, %s666_s26 }
  0x44   : > { %p669_p2 = pnand %p667_p0, %p830_p10 }
  0x45   : > { %p674_p6 = por %p673_p5, %p672_p4 }
  0x46   : > { %p670_p3 = pneg %p669_p2 }
  0x48   : > { %p675_p9 = pnand %p674_p6, %p670_p3 }
  0x4a   : > { %678 = shalt.err (!%p675_p9)
}
  0x4b   : > { %s679_s25 = scalar_lea.vmem %s888_s30, 512  ;;  %s736_s8 = smov [#allocation6]  }
  0x4c   : > { %p680_p11 = scmp.ne.s32.totalorder %s888_s30, %s679_s25  ;;  %s684_s18 = sshll.u32 %s736_s8, 4  ;;  %s685_s18 = int_to_ptr.vmem [resolvable:$false] %s684_s18 }
  0x4d   : > { %s686_s12 = scalar_lea.vmem %s685_s18, 1024  ;;  %p687_p7 = scmp.lt.s32.totalorder %s888_s30, %s685_s18 }
  0x4e   : > { %p682_p12 = pnand %p680_p11, %p830_p10  ;;  %p688_p1 = scmp.lt.s32.totalorder %s686_s12, %s679_s25 }
  0x50   : > { %p683_p13 = pneg %p682_p12  ;;  %p689_p0 = por %p688_p1, %p687_p7 }
  0x52   : > { %p690_p2 = pnand %p689_p0, %p683_p13 }
  0x54   : > { %693 = shalt.err (!%p690_p2)
}
  0x55   : > { %s737_s14 = smov 128   ;;  %s738_s7 = smov 8  }
  0x56   : > { %570 = dma.hbm_to_vmem [thread:$0]  (!%p810_p8), %s884_s28, 512, %s888_s30, %s824_s9, %s737_s14, %s737_s14, %s738_s7  }
  0x57   : > { %p964_p10 = scmp.ne.s32.totalorder %s963_s6, 0 }
  0x58   : > { %s914_s11 = sand.u32 (!%p964_p10), 1, %s724_s16   ;;  %p965_p3 = scmp.ne.s32.totalorder (!%p964_p10), %s960_s24, 0 }
  0x59   : > { %231 = sbr.rel (%p964_p10) target bundleno = 308 (0x134), region = 36  ;;  %s234_s22 = scalar_lea.sflag (!%p964_p10), [#allocation3], %s914_s11 }
  0x5a   : > { %s236_s29 = scalar_lea.vmem (!%p964_p10), [#allocation2], %s914_s11 }
  0x5e   : > { %711 = dma.done.wait (%p965_p3), %s234_s22, 16  }
  0x5f   : > { %713 = vsyncadd (%p965_p3), %s234_s22, 4294967280  ;;  %s241_s27 = sand.u32 1, %s785_s19   ;;  %s244_s6 = scalar_lea.vmem [#allocation4], %s914_s11 }
  0x60   : > { %s242_s9 = scalar_lea.sflag [#allocation5], %s241_s27 }
  0x61   : > { %715 = dma.done.wait (%p965_p3), %s242_s9, 528  }
  0x62   : > { %717 = vsyncadd (%p965_p3), %s242_s9, 4294966768  ;;  %p288_p8 = scmp.lt.s32.totalorder %s785_s19, 1  ;;  %v301_v0 = vlaneseq  ;;  %v739_v1 = vmov 0.0   ;;  %s532_s28 = sshll.u32 %s914_s11, 5  ;;  %vm740_vm0 = vmmov 0   ;;  %vm335_vm5 = vcmask 261120  }
  0x63   : > { %544 = vmatprep.subr.mxu0 %v739_v1  ;;  %552 = vmatprep.mubr.msk.f32.mxu0 %vm740_vm0, %v739_v1  ;;  %s253_s24 = scalar_lea.vmem [#allocation6], %s532_s28  ;;  %v295_v9 = vld [vmem:[%s236_s29] sm:$0x1]  ;;  %vm326_vm6 = vcmask 256000  }
  0x64   : > { %v302_v2 = vshrl.u32 %v301_v0, 7  ;;  %s971_s19 = smov (!%p288_p8, %s785_s19), 1  ;;  %v304_v3 = vand.u32 127, %v301_v0  ;;  %v334_v7 = vld [vmem:[%s253_s24 + $0x18] sm:$0xff]  ;;  %v333_v8 = vld [vmem:[%s253_s24 + $0x10] sm:$0xff]  ;;  %v332_v12 = vld [vmem:[%s253_s24 + $0x8] sm:$0xff] }
  0x65   : > { %s290_s10 = scalar_lea.vmem %s956_s2, %s971_s19  ;;  %545 = vmatpush3.msra.mxu0 %v334_v7  ;;  %v296_v10 = vld [vmem:[%s244_s6] sm:$0x1]  ;;  %v298_v13 = vsub.f32 1.0, %v295_v9  ;;  %v331_v16 = vld [vmem:[%s253_s24] sm:$0xff]  ;;  %s533_s13 = sshll.u32 %s971_s19, 2 }
  0x66   : > { %v534_v4 = vadd.s32 4294967295, %v302_v2  ;;  %v315_v6 = vsub.s32 0, %v302_v2  ;;  %546 = vmatprep.subr.mxu0 %v739_v1  ;;  %v297_v14 = vld [vmem:[%s290_s10] sm:$0x1]  ;;  %vm311_vm4 = vcmp.eq.s32.totalorder %v302_v2, 0  ;;  %s294_s21 = scalar_lea.vmem %s958_s4, %s533_s13 }
  0x67   : > { %547 = vmatpush3.msra.mxu0 %v333_v8  ;;  %v299_v17 = vsub.f32 %v298_v13, %v296_v10 }
  0x68   : > { %v306_v5 = vmul.u32 16, %v534_v4  ;;  %v316_v15 = vrot.slane %v296_v10, %v315_v6  ;;  %548 = vmatprep.subr.mxu0 %v739_v1 }
  0x69   : > { %549 = vmatpush3.msra.mxu0 %v332_v12  ;;  %v300_v18 = vmul.f32 %v299_v17, %v297_v14 }
  0x6a   : > { %vm307_vm1 = vcmp.ge.s32.totalorder %v304_v3, %v306_v5  ;;  %v308_v11 = vadd.s32 16, %v306_v5  ;;  %550 = vmatprep.subr.mxu0 %v739_v1 }
  0x6b   : > { %551 = vmatpush3.msra.mxu0 %v331_v16  ;;  %v323_v20 = vrot.slane %v300_v18, %v315_v6 }
  0x6c   : > { %vm309_vm2 = vcmp.lt.s32.totalorder %v304_v3, %v308_v11 }
  0x6d   : > { %vm310_vm3 = vmand %vm307_vm1, %vm309_vm2 }
  0x6e   : > { %v318_v19 = vsel %vm310_vm3, %v316_v15, 0.0 }
  0x6f   : > { %v325_v21 = vsel %vm311_vm4, %v323_v20, %v318_v19 }
  0x70   : > { %553 = vmatmul.mubr.msk.f32.vlgmr.msra.gmra.mxu0 %vm335_vm5, %v325_v21  ;;  %v327_v22 = vsel %vm326_vm6, %v325_v21, 0.0 }
  0x71   : > { %328 = vadd.xlane.f32.xlu0 %v327_v22 }
  0xfa   : > { %v329_v23 = vpop.xlane.xlu0 %328 }
  0xfb   : > { %v330_v24 = vadd.f32 1e-08, %v329_v23 }
  0xfd   : > { %608 = vrcp.f32 %v330_v24 }
 0x10a   : > { %v609_v25 = vpop.eup %608 }
 0x130   : > { %v405_v26 = vpop.f32.mrf.mxu0 }
 0x131   : > { %v410_v27 = vmul.f32 %v609_v25, %v405_v26 }
 0x132   : > { %v554_v28 = vpop.f32.mrf.mxu0 }
 0x133   : > { %411 = vst.msk [vmem:[%s294_s21] sm:$0x7] %vm326_vm6, %v410_v27 }
 0x134 PF: > { %p17_p4 = scmp.ge.s32.totalorder %s788_s20, 4   ;;  %s966_s15 = smov %s724_s16 }
 0x135   : > { %s967_s16 = smov %s728_s17  ;;  %s968_s17 = smov %s798_s23 }
 0x136   : > { %s969_s18 = smov %s788_s20  ;;  %19 = sbr.rel (!%p17_p4) target bundleno = 5 (0x5), region = 103 }
 0x13b   :  { %431 = vsyncpa [#allocation3], 1 }
 0x13c   :  { %433 = vsyncpa [#allocation3 + $0x1], 1 }
 0x13d   :  { %434 = vsyncpa [#allocation5], 1 }
 0x13e   :  { %436 = vsyncpa [#allocation5 + $0x1], 1 }

</bundles_post_ra>
